<compile_context>
chip_gen: v5e
topology: v5e:2x2
jax: 0.10.0
libtpu: 0.0.40
codegen_flags: <defaults>
</compile_context>

<pallas_src>
import numpy as np
import jax
import jax.numpy as jnp
from jax.experimental import pallas as pl
from jax.experimental.pallas import tpu as pltpu


def _make_cat_dma_kernel(num_inputs, offsets, widths):
    """Kernel: N concurrent HBM->HBM DMAs, one per input, into the output's
    static column window. Start all, then wait all (keeps the HBM pipe full
    instead of serializing input-i read with input-(i-1) write)."""

    def kernel(*refs):
        in_refs = refs[:num_inputs]
        out_ref = refs[num_inputs]
        sem = refs[num_inputs + 1]

        copies = []
        for i, (in_ref, off, w) in enumerate(zip(in_refs, offsets, widths)):
            cp = pltpu.make_async_copy(
                in_ref,                              # whole (P, w_i) HBM slab
                out_ref.at[:, pl.ds(off, w)],        # its column window in out
                sem.at[i],
            )
            cp.start()
            copies.append(cp)
        for cp in copies:
            cp.wait()

    return kernel


def cat_pallas(tensors, dim):
    """Equivalent of torch.cat(tensors, dim=dim) using a Pallas TPU kernel."""
    tensors = [jnp.asarray(t) for t in tensors]
    if not tensors:
        raise ValueError("cat_pallas requires at least one input tensor")

    shapes = [tuple(t.shape) for t in tensors]
    ndim = len(shapes[0])
    d = dim % ndim
    dtype = tensors[0].dtype

    # Validation (review correctness concern): identical rank, identical
    # extents on every non-concat dim, identical dtype.
    for t, s in zip(tensors, shapes):
        if len(s) != ndim:
            raise ValueError(f"rank mismatch: {s} vs {shapes[0]}")
        if t.dtype != dtype:
            raise ValueError(f"dtype mismatch: {t.dtype} vs {dtype}")
        for ax in range(ndim):
            if ax != d and s[ax] != shapes[0][ax]:
                raise ValueError(
                    f"non-concat dim mismatch at axis {ax}: {s} vs {shapes[0]}")

    # Glue: collapse each input to a 2-D slab (P, C_i * Q).
    P = int(np.prod(shapes[0][:d], dtype=np.int64)) if d > 0 else 1
    Q = int(np.prod(shapes[0][d + 1:], dtype=np.int64)) if d + 1 < ndim else 1
    widths = [int(s[d]) * Q for s in shapes]
    offsets = [int(o) for o in np.cumsum([0] + widths[:-1])]
    total = int(sum(widths))
    slabs = [t.reshape(P, w) for t, w in zip(tensors, widths)]

    kernel = _make_cat_dma_kernel(len(slabs), offsets, widths)

    out2d = pl.pallas_call(
        kernel,
        out_shape=jax.ShapeDtypeStruct((P, total), dtype),
        # Everything stays in HBM; the kernel moves bytes with explicit DMAs.
        in_specs=[pl.BlockSpec(memory_space=pl.ANY) for _ in slabs],
        out_specs=pl.BlockSpec(memory_space=pl.ANY),
        scratch_shapes=[pltpu.SemaphoreType.DMA((len(slabs),))],
    )(*slabs)

    out_shape = (shapes[0][:d]
                 + (sum(s[d] for s in shapes),)
                 + shapes[0][d + 1:])
    return out2d.reshape(out_shape)


if __name__ == "__main__":
    key = jax.random.PRNGKey(0)
    k1, k2, k3 = jax.random.split(key, 3)

    # NCHW inputs, concat along channel dim (dim=1), like _Cat(dim=1).
    x1 = jax.random.normal(k1, (2, 4, 16, 16), dtype=jnp.float32)
    x2 = jax.random.normal(k2, (2, 6, 16, 16), dtype=jnp.float32)
    x3 = jax.random.normal(k3, (2, 2, 16, 16), dtype=jnp.float32)

    out = jax.block_until_ready(cat_pallas([x1, x2, x3], dim=1))
    ref = jnp.concatenate([x1, x2, x3], axis=1)
    assert out.shape == (2, 12, 16, 16), out.shape
    assert out.dtype == ref.dtype
    np.testing.assert_array_equal(np.asarray(out), np.asarray(ref))

    # Concat along the last axis (small, unaligned widths) to check generality.
    y1 = jax.random.normal(k1, (2, 4, 16, 8), dtype=jnp.float32)
    y2 = jax.random.normal(k2, (2, 4, 16, 24), dtype=jnp.float32)
    out2 = jax.block_until_ready(cat_pallas([y1, y2], dim=3))
    np.testing.assert_array_equal(
        np.asarray(out2), np.asarray(jnp.concatenate([y1, y2], axis=3)))

    # Concat along dim=0 (leading-prefix P == 1 edge case).
    z1 = jax.random.normal(k1, (3, 8, 128), dtype=jnp.float32)
    z2 = jax.random.normal(k3, (5, 8, 128), dtype=jnp.float32)
    out3 = jax.block_until_ready(cat_pallas([z1, z2], dim=0))
    np.testing.assert_array_equal(
        np.asarray(out3), np.asarray(jnp.concatenate([z1, z2], axis=0)))

    print("KERNEL_OK")
</pallas_src>

<mosaic_0001>
module attributes {stable_mosaic.version = 11 : i64} {
  func.func @kernel(%arg0: memref<2x1024xf32, #tpu.memory_space<any>>, %arg1: memref<2x1536xf32, #tpu.memory_space<any>>, %arg2: memref<2x512xf32, #tpu.memory_space<any>>, %arg3: memref<2x3072xf32, #tpu.memory_space<any>>, %arg4: memref<3x!tpu.dma_semaphore, #tpu.memory_space<semaphore_mem>>) attributes {dimension_semantics = [], scalar_prefetch = 0 : i64, scratch_operands = 1 : i64, tpu.core_type = #tpu.core_type<tc>} {
    %c0_i32 = arith.constant 0 : i32
    %c0_i32_0 = arith.constant 0 : i32
    %c0_i32_1 = arith.constant 0 : i32
    %0 = tpu.memref_slice %arg3[%c0_i32_0, %c0_i32_1] : memref<2x3072xf32, #tpu.memory_space<any>> -> memref<2x1024xf32, #tpu.memory_space<any>>
    %1 = tpu.memref_slice %arg4[%c0_i32] : memref<3x!tpu.dma_semaphore, #tpu.memory_space<semaphore_mem>> -> memref<1x!tpu.dma_semaphore, #tpu.memory_space<semaphore_mem>>
    %2 = tpu.memref_squeeze %1 : memref<1x!tpu.dma_semaphore, #tpu.memory_space<semaphore_mem>> -> memref<!tpu.dma_semaphore, #tpu.memory_space<semaphore_mem>>
    tpu.enqueue_dma source(%arg0 : memref<2x1024xf32, #tpu.memory_space<any>>) target(%0 : memref<2x1024xf32, #tpu.memory_space<any>>) target_semaphore(%2 : memref<!tpu.dma_semaphore, #tpu.memory_space<semaphore_mem>>)
    %c1_i32 = arith.constant 1 : i32
    %c0_i32_2 = arith.constant 0 : i32
    %c1024_i32 = arith.constant 1024 : i32
    %3 = tpu.memref_slice %arg3[%c0_i32_2, %c1024_i32] : memref<2x3072xf32, #tpu.memory_space<any>> -> memref<2x1536xf32, #tpu.memory_space<any>>
    %4 = tpu.memref_slice %arg4[%c1_i32] : memref<3x!tpu.dma_semaphore, #tpu.memory_space<semaphore_mem>> -> memref<1x!tpu.dma_semaphore, #tpu.memory_space<semaphore_mem>>
    %5 = tpu.memref_squeeze %4 : memref<1x!tpu.dma_semaphore, #tpu.memory_space<semaphore_mem>> -> memref<!tpu.dma_semaphore, #tpu.memory_space<semaphore_mem>>
    tpu.enqueue_dma source(%arg1 : memref<2x1536xf32, #tpu.memory_space<any>>) target(%3 : memref<2x1536xf32, #tpu.memory_space<any>>) target_semaphore(%5 : memref<!tpu.dma_semaphore, #tpu.memory_space<semaphore_mem>>)
    %c2_i32 = arith.constant 2 : i32
    %c0_i32_3 = arith.constant 0 : i32
    %c2560_i32 = arith.constant 2560 : i32
    %6 = tpu.memref_slice %arg3[%c0_i32_3, %c2560_i32] : memref<2x3072xf32, #tpu.memory_space<any>> -> memref<2x512xf32, #tpu.memory_space<any>>
    %7 = tpu.memref_slice %arg4[%c2_i32] : memref<3x!tpu.dma_semaphore, #tpu.memory_space<semaphore_mem>> -> memref<1x!tpu.dma_semaphore, #tpu.memory_space<semaphore_mem>>
    %8 = tpu.memref_squeeze %7 : memref<1x!tpu.dma_semaphore, #tpu.memory_space<semaphore_mem>> -> memref<!tpu.dma_semaphore, #tpu.memory_space<semaphore_mem>>
    tpu.enqueue_dma source(%arg2 : memref<2x512xf32, #tpu.memory_space<any>>) target(%6 : memref<2x512xf32, #tpu.memory_space<any>>) target_semaphore(%8 : memref<!tpu.dma_semaphore, #tpu.memory_space<semaphore_mem>>)
    %c0_i32_4 = arith.constant 0 : i32
    %c0_i32_5 = arith.constant 0 : i32
    %c0_i32_6 = arith.constant 0 : i32
    %9 = tpu.memref_slice %arg3[%c0_i32_5, %c0_i32_6] : memref<2x3072xf32, #tpu.memory_space<any>> -> memref<2x1024xf32, #tpu.memory_space<any>>
    %10 = tpu.memref_slice %arg4[%c0_i32_4] : memref<3x!tpu.dma_semaphore, #tpu.memory_space<semaphore_mem>> -> memref<1x!tpu.dma_semaphore, #tpu.memory_space<semaphore_mem>>
    %11 = tpu.memref_squeeze %10 : memref<1x!tpu.dma_semaphore, #tpu.memory_space<semaphore_mem>> -> memref<!tpu.dma_semaphore, #tpu.memory_space<semaphore_mem>>
    tpu.wait_dma2 semaphore(%11 : memref<!tpu.dma_semaphore, #tpu.memory_space<semaphore_mem>>) src(%arg0 : memref<2x1024xf32, #tpu.memory_space<any>>) dst(%9 : memref<2x1024xf32, #tpu.memory_space<any>>)
    %c1_i32_7 = arith.constant 1 : i32
    %c0_i32_8 = arith.constant 0 : i32
    %c1024_i32_9 = arith.constant 1024 : i32
    %12 = tpu.memref_slice %arg3[%c0_i32_8, %c1024_i32_9] : memref<2x3072xf32, #tpu.memory_space<any>> -> memref<2x1536xf32, #tpu.memory_space<any>>
    %13 = tpu.memref_slice %arg4[%c1_i32_7] : memref<3x!tpu.dma_semaphore, #tpu.memory_space<semaphore_mem>> -> memref<1x!tpu.dma_semaphore, #tpu.memory_space<semaphore_mem>>
    %14 = tpu.memref_squeeze %13 : memref<1x!tpu.dma_semaphore, #tpu.memory_space<semaphore_mem>> -> memref<!tpu.dma_semaphore, #tpu.memory_space<semaphore_mem>>
    tpu.wait_dma2 semaphore(%14 : memref<!tpu.dma_semaphore, #tpu.memory_space<semaphore_mem>>) src(%arg1 : memref<2x1536xf32, #tpu.memory_space<any>>) dst(%12 : memref<2x1536xf32, #tpu.memory_space<any>>)
    %c2_i32_10 = arith.constant 2 : i32
    %c0_i32_11 = arith.constant 0 : i32
    %c2560_i32_12 = arith.constant 2560 : i32
    %15 = tpu.memref_slice %arg3[%c0_i32_11, %c2560_i32_12] : memref<2x3072xf32, #tpu.memory_space<any>> -> memref<2x512xf32, #tpu.memory_space<any>>
    %16 = tpu.memref_slice %arg4[%c2_i32_10] : memref<3x!tpu.dma_semaphore, #tpu.memory_space<semaphore_mem>> -> memref<1x!tpu.dma_semaphore, #tpu.memory_space<semaphore_mem>>
    %17 = tpu.memref_squeeze %16 : memref<1x!tpu.dma_semaphore, #tpu.memory_space<semaphore_mem>> -> memref<!tpu.dma_semaphore, #tpu.memory_space<semaphore_mem>>
    tpu.wait_dma2 semaphore(%17 : memref<!tpu.dma_semaphore, #tpu.memory_space<semaphore_mem>>) src(%arg2 : memref<2x512xf32, #tpu.memory_space<any>>) dst(%15 : memref<2x512xf32, #tpu.memory_space<any>>)
    return
  }
}

</mosaic_0001>

<bundles_post_ra>
// kernel: tpu_custom_call.1
= control target key start
LH: loop header
LB: loop body
LE: loop exit
PB: predicated region body
PF: predicated region fallthrough
CT: control target
= control target key end

     0   :  { %s91_s21 = smov [#allocation2]   ;;  %s92_s22 = smov [#allocation3]   ;;  %s136_s0 = inlined_call_operand.hbm [shape: f32[2,1024], index: 0, kind: input, shape index: {}]   ;;  %s137_s3 = inlined_call_operand.hbm [shape: f32[2,3072], index: 3, kind: output, shape index: {}]   ;;  %s138_s1 = inlined_call_operand.hbm [shape: f32[2,1536], index: 1, kind: input, shape index: {}]   ;;  %s139_s2 = inlined_call_operand.hbm [shape: f32[2,512], index: 2, kind: input, shape index: {}]  }
   0x1   :  { %s12_s14 = sshll.u32 %s136_s0, 4  ;;  %s14_s17 = sshll.u32 %s137_s3, 4  ;;  %s13_s14 = int_to_ptr.hbm [resolvable:$true] %s12_s14  ;;  %s15_s17 = int_to_ptr.hbm [resolvable:$true] %s14_s17 }
   0x2   :  { %s19_s20 = scalar_lea.hbm %s137_s3, 16  ;;  %s93_s23 = smov 0  }
   0x3   :  { %18 = dma.general %s13_s14, 256, %s15_s17, %s91_s21, %s92_s22, [#allocation4], %s93_s23, 0  }
   0x4   :  { %s25_s26 = sshll.u32 %s138_s1, 4  ;;  %s27_s27 = sshll.u32 %s19_s20, 4  ;;  %s26_s26 = int_to_ptr.hbm [resolvable:$true] %s25_s26  ;;  %s28_s27 = int_to_ptr.hbm [resolvable:$true] %s27_s27 }
   0x5   :  { %s94_s0 = smov [#allocation2 + $0x1]   ;;  %s95_s28 = smov [#allocation5]  }
   0x6   :  { %31 = dma.general %s26_s26, 384, %s28_s27, %s94_s0, %s95_s28, [#allocation6], %s93_s23, 0  }
   0x7   :  { %s32_s4 = scalar_lea.hbm %s137_s3, 40  ;;  %s38_s7 = sshll.u32 %s139_s2, 4  ;;  %s39_s7 = int_to_ptr.hbm [resolvable:$true] %s38_s7 }
   0x8   :  { %s40_s8 = sshll.u32 %s32_s4, 4  ;;  %s96_s9 = smov [#allocation2 + $0x2]   ;;  %s41_s8 = int_to_ptr.hbm [resolvable:$true] %s40_s8 }
   0x9   :  { %s97_s10 = smov [#allocation7]  }
   0xa   :  { %44 = dma.general %s39_s7, 128, %s41_s8, %s96_s9, %s97_s10, [#allocation8], %s93_s23, 0  }
   0xb   :  { %85 = dma.done.wait [#allocation2], 256 }
   0xc   :  { %86 = vsyncadd [#allocation2], 4294967040 }
   0xd   :  { %87 = dma.done.wait [#allocation2 + $0x1], 384 }
   0xe   :  { %88 = vsyncadd [#allocation2 + $0x1], 4294966912 }
   0xf   :  { %89 = dma.done.wait [#allocation2 + $0x2], 128 }
  0x10   :  { %90 = vsyncadd [#allocation2 + $0x2], 4294967168 }
  0x11   :  { %55 = vsyncmov [#allocation2] }
  0x14   :  { %s56_s1 = vpop.sfrf %55 }
  0x15   :  { %p75_p0 = scmp.ne.s32.totalorder %s56_s1, 0 }
  0x17   :  { %60 = shalt.err (%p75_p0)  }
  0x18   :  { %62 = vsyncmov [#allocation2 + $0x1] }
  0x1b   :  { %s63_s3 = vpop.sfrf %62 }
  0x1c   :  { %p76_p1 = scmp.ne.s32.totalorder %s63_s3, 0 }
  0x1e   :  { %67 = shalt.err (%p76_p1)  }
  0x1f   :  { %69 = vsyncmov [#allocation2 + $0x2] }
  0x22   :  { %s70_s2 = vpop.sfrf %69 }
  0x23   :  { %p77_p2 = scmp.ne.s32.totalorder %s70_s2, 0 }
  0x25   :  { %74 = shalt.err (%p77_p2)  }

</bundles_post_ra>
